<compile_context>
chip_gen: v5e
topology: v5e:2x2
jax: 0.10.0
libtpu: 0.0.40
codegen_flags: <defaults>
</compile_context>

<pallas_src>
import jax
import jax.numpy as jnp
from jax.experimental import pallas as pl
from jax.experimental.pallas import tpu as pltpu


def _rescale_kernel(w_ref, x_ref, o_ref):
    # w_ref: (TR, 1) per-row channel scale; x_ref / o_ref: (TR, TW) lane-dense tile.
    o_ref[...] = x_ref[...] * w_ref[...]


def _round_down(v: int, m: int) -> int:
    return (v // m) * m


def _choose_tiles(rows: int, lanes: int, itemsize: int,
                  target_bytes: int = 2 * 1024 * 1024):
    """Pick a (TR, TW) tile that is lane-dense and roughly `target_bytes`."""
    # Lane tile: large multiple of 128 (unmasked stores). If the full lane
    # extent is not 128-aligned, full extent is the only legal block choice
    # (Pallas masks the partial lanes); padding would cost an extra HBM pass.
    if lanes % 128 == 0:
        lane_budget = max(128, _round_down(target_bytes // (itemsize * 8), 128))
        tw = min(lanes, lane_budget)
    else:
        tw = lanes
    # Row tile: fill the remaining byte budget with multiples of 8 rows
    # (or the full row extent, which is always legal).
    rows_budget = max(1, target_bytes // (tw * itemsize))
    if rows_budget >= rows:
        tr = rows
    else:
        tr = min(rows, max(8, _round_down(rows_budget, 8)))
    return tr, tw


def rescale(x: jax.Array, weight: jax.Array) -> jax.Array:
    """Pallas TPU implementation of Rescale.forward.

    Args:
      x: (N, C, H, W) array.
      weight: (C, 1, 1) per-channel scale.
    Returns:
      (N, C, H, W) array, same dtype as x.
    """
    N, C, H, W = x.shape
    assert weight.shape == (C, 1, 1)

    R = N * C          # one row per (n, c) pair
    L = H * W          # flattened spatial extent -> lane axis

    # Lane-dense views. The weight broadcast materializes only N*C scalars,
    # negligible vs. the 2*N*C*H*W element x/out HBM stream.
    x2 = x.reshape(R, L)
    w2 = (
        jnp.broadcast_to(weight.reshape(1, C), (N, C))
        .reshape(R, 1)
        .astype(x.dtype)
    )

    itemsize = jnp.dtype(x.dtype).itemsize
    TR, TW = _choose_tiles(R, L, itemsize)

    grid = (pl.cdiv(R, TR), pl.cdiv(L, TW))

    out2 = pl.pallas_call(
        _rescale_kernel,
        out_shape=jax.ShapeDtypeStruct((R, L), x.dtype),
        grid=grid,
        in_specs=[
            # Per-row scale: block index ignores the (inner) lane axis, so it
            # is only re-fetched when the row block changes.
            pl.BlockSpec((TR, 1), lambda i, j: (i, 0)),
            # x tile: lane-dense, byte-budgeted.
            pl.BlockSpec((TR, TW), lambda i, j: (i, j)),
        ],
        out_specs=pl.BlockSpec((TR, TW), lambda i, j: (i, j)),
        compiler_params=pltpu.CompilerParams(
            # Pure elementwise: both axes parallel so v7x's two TensorCores
            # can split the collapsed grid; no-op on v5e/v6e.
            dimension_semantics=("parallel", "parallel"),
            # ~2 MiB tiles, in+out double-buffered ~= 8 MiB; 32 MiB is safe on
            # every generation and raises v5e's 16 MiB scoped default.
            vmem_limit_bytes=32 * 1024 * 1024,
        ),
    )(w2, x2)

    return out2.reshape(N, C, H, W)


if __name__ == "__main__":
    N, C, H, W = 2, 4, 16, 16
    key = jax.random.PRNGKey(0)
    kx, kw = jax.random.split(key)

    x = jax.random.normal(kx, (N, C, H, W), dtype=jnp.float32)
    # Module initializes weight to ones; perturb deterministically so the
    # per-channel broadcast multiply is actually exercised.
    weight = jnp.ones((C, 1, 1), dtype=jnp.float32) + 0.1 * jax.random.normal(
        kw, (C, 1, 1), dtype=jnp.float32
    )

    out = jax.block_until_ready(rescale(x, weight))

    # Reference check against plain-JAX broadcasting (mirrors torch semantics).
    ref = weight * x
    assert out.shape == x.shape and out.dtype == x.dtype
    assert jnp.allclose(out, ref, atol=1e-6, rtol=1e-6)

    print("KERNEL_OK")
</pallas_src>

<mosaic_0001>
module attributes {stable_mosaic.version = 11 : i64} {
  func.func @_rescale_kernel(%arg0: i32, %arg1: i32, %arg2: memref<8x1xf32, #tpu.memory_space<vmem>>, %arg3: memref<8x256xf32, #tpu.memory_space<vmem>>, %arg4: memref<8x256xf32, #tpu.memory_space<vmem>>) attributes {dimension_semantics = [#tpu.dimension_semantics<parallel>, #tpu.dimension_semantics<parallel>], iteration_bounds = array<i64: 1, 1>, scalar_prefetch = 0 : i64, scratch_operands = 0 : i64, tpu.core_type = #tpu.core_type<tc>, window_params = [{transform_indices = @transform_0, window_bounds = array<i64: 8, 1>}, {transform_indices = @transform_1, window_bounds = array<i64: 8, 256>}, {transform_indices = @transform_2, window_bounds = array<i64: 8, 256>}]} {
    %c0 = arith.constant 0 : index
    %c0_0 = arith.constant 0 : index
    %0 = vector.load %arg3[%c0, %c0_0] : memref<8x256xf32, #tpu.memory_space<vmem>>, vector<8x256xf32>
    %c0_1 = arith.constant 0 : index
    %c0_2 = arith.constant 0 : index
    %1 = vector.load %arg2[%c0_1, %c0_2] : memref<8x1xf32, #tpu.memory_space<vmem>>, vector<8x1xf32>
    %2 = vector.broadcast %1 : vector<8x1xf32> to vector<8x256xf32>
    %3 = arith.mulf %0, %2 : vector<8x256xf32>
    %c0_3 = arith.constant 0 : index
    %c0_4 = arith.constant 0 : index
    %4 = vector.load %arg4[%c0_3, %c0_4] : memref<8x256xf32, #tpu.memory_space<vmem>>, vector<8x256xf32>
    tpu.vector_store %arg4[%c0_3, %c0_4], %3 {strides = array<i32>} : memref<8x256xf32, #tpu.memory_space<vmem>>, vector<8x256xf32>,
    return
  }
  func.func @transform_0(%arg0: i32, %arg1: i32) -> (i32, i32) {
    %c0_i32 = arith.constant 0 : i32
    %c0_i32_0 = arith.constant 0 : i32
    return %arg0, %c0_i32 : i32, i32
  }
  func.func @transform_1(%arg0: i32, %arg1: i32) -> (i32, i32) {
    %c0_i32 = arith.constant 0 : i32
    return %arg0, %arg1 : i32, i32
  }
  func.func @transform_2(%arg0: i32, %arg1: i32) -> (i32, i32) {
    %c0_i32 = arith.constant 0 : i32
    return %arg0, %arg1 : i32, i32
  }
}

</mosaic_0001>

<bundles_post_ra>
// kernel: tpu_custom_call.1
= control target key start
LH: loop header
LB: loop body
LE: loop exit
PB: predicated region body
PF: predicated region fallthrough
CT: control target
= control target key end

     0   :  { %7 = vsyncpa [#allocation3], 0  ;;  %s138_s0 = inlined_call_operand.vmem [shape: f32[8,1], index: 0, kind: input, shape index: {}]   ;;  %s139_s1 = inlined_call_operand.hbm [shape: f32[8,256], index: 1, kind: input, shape index: {}]   ;;  %s140_s2 = inlined_call_operand.hbm [shape: f32[8,256], index: 2, kind: output, shape index: {}]  }
   0x1   :  { %8 = vsyncpa [#allocation4], 0  ;;  %s16_s11 = sshll.u32 %s139_s1, 4  ;;  %s111_s12 = smov [#allocation2]   ;;  %s17_s11 = int_to_ptr.hbm [resolvable:$true] %s16_s11 }
   0x2   :  { %s18_s13 = sshll.u32 %s111_s12, 4  ;;  %s19_s13 = int_to_ptr.vmem [resolvable:$true] %s18_s13 }
   0x3   :  { %21 = dma.hbm_to_vmem [thread:$0]  %s17_s11, 256, %s19_s13, [#allocation3]  }
   0x4   :  { %107 = dma.done.wait [#allocation3], 256  }
   0x5   :  { %108 = vsyncadd [#allocation3], 4294967040  ;;  %v112_v0 = vmov 0   ;;  %v28_v1 = vld [vmem:[%s138_s0] sm:$0xff]  ;;  %v27_v3 = vld [vmem:[#allocation2 + $0x8] sm:$0xff]  ;;  %s113_s16 = smov [#allocation5]  }
   0x6   :  { %58 = vset.pattern.permute.xlu0 %v112_v0  ;;  %v26_v2 = vld [vmem:[#allocation2] sm:$0xff]  ;;  %s43_s17 = sshll.u32 %s113_s16, 4  ;;  %s45_s19 = sshll.u32 %s140_s2, 4  ;;  %s44_s17 = int_to_ptr.vmem [resolvable:$true] %s43_s17  ;;  %s46_s19 = int_to_ptr.hbm [resolvable:$true] %s45_s19 }
   0x7   :  { %31 = vperm.xlu0 %58, %v28_v1  }
  0x79   :  { %v32_v4 = vpop.permute.xlu0 %31 }
  0x7a   :  { %v34_v5 = vmul.f32 %v32_v4, %v26_v2  ;;  %v35_v6 = vmul.f32 %v32_v4, %v27_v3 }
  0x7c   :  { %36 = vst [vmem:[#allocation5] sm:$0xff] %v34_v5 }
  0x7d   :  { %37 = vst [vmem:[#allocation5 + $0x8] sm:$0xff] %v35_v6 }
  0x7e   :  { %48 = dma.vmem_to_hbm [thread:$0]  %s44_s17, 256, %s46_s19, [#allocation4]  }
  0x7f   :  { %109 = dma.done.wait [#allocation4], 256  }
  0x80   :  { %110 = vsyncadd [#allocation4], 4294967040 }
  0x81   :  { %53 = vsyncpa [#allocation3], 1 }
  0x82   :  { %54 = vsyncpa [#allocation4], 1 }

</bundles_post_ra>
